<compile_context>
chip_gen: v6e
topology: v6e:2x2x1
jax: 0.10.0
libtpu: 0.0.40
codegen_flags: <defaults>
</compile_context>

<pallas_src>
import jax
import jax.numpy as jnp
from jax import lax
from jax.experimental import pallas as pl
from jax.experimental.pallas import tpu as pltpu

# global_define.DataSize is external; pick a small deterministic value.
DATA_SIZE = 64
HIDDEN = 256

# Contract the last (hidden) axis of both operands: (8,H) x (TB,H) -> (8,TB).
_NT_DIMS = (((1,), (1,)), ((), ()))


def _disc_kernel(x_ref, w1_ref, b1_ref, w2_ref, b2_ref, w4_ref, b4_ref, o_ref):
    x = x_ref[...]  # (TB, DATA_SIZE) f32

    # fc1 + leaky_relu (negative_slope = 0.01, F.leaky_relu default)
    h = jnp.dot(x, w1_ref[...], preferred_element_type=jnp.float32) + b1_ref[...]
    h = jnp.maximum(h, 0.01 * h)

    # fc2 + leaky_relu
    h = jnp.dot(h, w2_ref[...], preferred_element_type=jnp.float32) + b2_ref[...]
    h = jnp.maximum(h, 0.01 * h)

    # fc4 + sigmoid, produced lane-dense as a (1, TB) row.
    # w4 is stored padded to the MXU sublane count: (8, HIDDEN) with only row 0
    # real.  One NT matmul pass gives (8, TB); keep row 0.
    logits8 = lax.dot_general(
        w4_ref[...], h, _NT_DIMS, preferred_element_type=jnp.float32
    )
    logit = logits8[0:1, :] + b4_ref[...]          # (1, TB)
    o_ref[...] = jax.nn.sigmoid(logit)             # unmasked, lane-dense store


def discriminator_forward(x, params, *, tile_b=1024):
    """x: [B, DATA_SIZE] float32 -> flat [B] float32 (matches x.view(-1))."""
    w1, b1, w2, b2, w4, b4 = params
    B = x.shape[0]

    if B <= tile_b:
        # Single block: block shapes equal the full array dims, any B allowed.
        TB = B
        num_tiles = 1
        Bp = B
    else:
        # Multi-tile: keep TB a multiple of 128 so the (1, TB) output block and
        # the (TB, DATA_SIZE) input block satisfy the (8, 128) layout rule.
        TB = max(128, (tile_b // 128) * 128)
        num_tiles = pl.cdiv(B, TB)
        Bp = num_tiles * TB

    x_in = x if Bp == B else jnp.pad(x, ((0, Bp - B), (0, 0)))

    out = pl.pallas_call(
        _disc_kernel,
        out_shape=jax.ShapeDtypeStruct((1, Bp), jnp.float32),
        grid=(num_tiles,),
        in_specs=[
            # activations: tiled over the batch grid axis
            pl.BlockSpec((TB, DATA_SIZE), lambda i: (i, 0)),
            # weights / biases: same block every step -> VMEM-resident
            pl.BlockSpec((DATA_SIZE, HIDDEN), lambda i: (0, 0)),
            pl.BlockSpec((1, HIDDEN), lambda i: (0, 0)),
            pl.BlockSpec((HIDDEN, HIDDEN), lambda i: (0, 0)),
            pl.BlockSpec((1, HIDDEN), lambda i: (0, 0)),
            pl.BlockSpec((8, HIDDEN), lambda i: (0, 0)),   # w4 padded to 8 rows
            pl.BlockSpec((1, 1), lambda i: (0, 0)),
        ],
        # Lane-dense output row: unmasked stores + contiguous writeback DMA.
        out_specs=pl.BlockSpec((1, TB), lambda i: (0, i)),
        compiler_params=pltpu.CompilerParams(
            dimension_semantics=("parallel",),
            vmem_limit_bytes=32 * 1024 * 1024,
        ),
    )(x_in, w1, b1, w2, b2, w4, b4)

    return out.reshape(-1)[:B]


def init_params(key, mean=0.0, std=0.02):
    """Mirrors weight_init(mean, std): normal weights, zero biases.
    fc1/fc2 weights stored as [in, out]; fc4 weight stored as an (8, HIDDEN)
    sublane-padded block whose row 0 is the real weight row."""
    k1, k2, k4 = jax.random.split(key, 3)
    w1 = mean + std * jax.random.normal(k1, (DATA_SIZE, HIDDEN), jnp.float32)
    b1 = jnp.zeros((1, HIDDEN), jnp.float32)
    w2 = mean + std * jax.random.normal(k2, (HIDDEN, HIDDEN), jnp.float32)
    b2 = jnp.zeros((1, HIDDEN), jnp.float32)
    w4_row = mean + std * jax.random.normal(k4, (HIDDEN,), jnp.float32)
    w4 = jnp.zeros((8, HIDDEN), jnp.float32).at[0].set(w4_row)
    b4 = jnp.zeros((1, 1), jnp.float32)
    return (w1, b1, w2, b2, w4, b4)


def _reference(x, params):
    w1, b1, w2, b2, w4, b4 = params
    h = x @ w1 + b1
    h = jnp.where(h > 0, h, 0.01 * h)
    h = h @ w2 + b2
    h = jnp.where(h > 0, h, 0.01 * h)
    h = jnp.sum(h * w4[0:1, :], axis=-1, keepdims=True) + b4
    return jax.nn.sigmoid(h).reshape(-1)


if __name__ == "__main__":
    key = jax.random.PRNGKey(0)
    kx, kx2, kp = jax.random.split(key, 3)
    params = init_params(kp, mean=0.0, std=0.02)

    # Case 1: small batch, single block.
    B1 = 8
    x1 = jax.random.normal(kx, (B1, DATA_SIZE), jnp.float32)
    out1 = jax.block_until_ready(discriminator_forward(x1, params))
    ref1 = _reference(x1, params)
    assert out1.shape == (B1,)
    assert jnp.allclose(out1, ref1, atol=1e-5, rtol=1e-5)

    # Case 2: batch that exercises the grid + padding path (3 tiles of 128).
    B2 = 300
    x2 = jax.random.normal(kx2, (B2, DATA_SIZE), jnp.float32)
    out2 = jax.block_until_ready(discriminator_forward(x2, params, tile_b=128))
    ref2 = _reference(x2, params)
    assert out2.shape == (B2,)
    assert jnp.allclose(out2, ref2, atol=1e-5, rtol=1e-5)

    print("KERNEL_OK")
</pallas_src>

<mosaic_0001>
module attributes {stable_mosaic.version = 11 : i64} {
  func.func @_disc_kernel(%arg0: i32, %arg1: memref<8x64xf32, #tpu.memory_space<vmem>>, %arg2: memref<64x256xf32, #tpu.memory_space<vmem>>, %arg3: memref<1x256xf32, #tpu.memory_space<vmem>>, %arg4: memref<256x256xf32, #tpu.memory_space<vmem>>, %arg5: memref<1x256xf32, #tpu.memory_space<vmem>>, %arg6: memref<8x256xf32, #tpu.memory_space<vmem>>, %arg7: memref<1x1xf32, #tpu.memory_space<vmem>>, %arg8: memref<1x8xf32, #tpu.memory_space<vmem>>) attributes {dimension_semantics = [#tpu.dimension_semantics<parallel>], iteration_bounds = array<i64: 1>, scalar_prefetch = 0 : i64, scratch_operands = 0 : i64, tpu.core_type = #tpu.core_type<tc>, window_params = [{transform_indices = @transform_0, window_bounds = array<i64: 8, 64>}, {pipeline_mode = #tpu.pipeline_mode<synchronous>, transform_indices = @transform_1, window_bounds = array<i64: 64, 256>}, {pipeline_mode = #tpu.pipeline_mode<synchronous>, transform_indices = @transform_2, window_bounds = array<i64: 1, 256>}, {pipeline_mode = #tpu.pipeline_mode<synchronous>, transform_indices = @transform_3, window_bounds = array<i64: 256, 256>}, {pipeline_mode = #tpu.pipeline_mode<synchronous>, transform_indices = @transform_4, window_bounds = array<i64: 1, 256>}, {pipeline_mode = #tpu.pipeline_mode<synchronous>, transform_indices = @transform_5, window_bounds = array<i64: 8, 256>}, {pipeline_mode = #tpu.pipeline_mode<synchronous>, transform_indices = @transform_6, window_bounds = array<i64: 1, 1>}, {transform_indices = @transform_7, window_bounds = array<i64: 1, 8>}]} {
    %c0 = arith.constant 0 : index
    %c0_0 = arith.constant 0 : index
    %0 = vector.load %arg1[%c0, %c0_0] : memref<8x64xf32, #tpu.memory_space<vmem>>, vector<8x64xf32>
    %c0_1 = arith.constant 0 : index
    %c0_2 = arith.constant 0 : index
    %1 = vector.load %arg2[%c0_1, %c0_2] : memref<64x256xf32, #tpu.memory_space<vmem>>, vector<64x256xf32>
    %cst = arith.constant dense<0.000000e+00> : vector<8x256xf32>
    %2 = tpu.matmul %0, %1, %cst {dimension_numbers = #tpu.dot_dimension_numbers<[1], [0], [0], [1], [0, 0, 1, 1], [], []>} : vector<8x64xf32>, vector<64x256xf32>, vector<8x256xf32> -> vector<8x256xf32>
    %c0_3 = arith.constant 0 : index
    %c0_4 = arith.constant 0 : index
    %3 = vector.load %arg3[%c0_3, %c0_4] : memref<1x256xf32, #tpu.memory_space<vmem>>, vector<1x256xf32>
    %4 = vector.broadcast %3 : vector<1x256xf32> to vector<8x256xf32>
    %5 = arith.addf %2, %4 : vector<8x256xf32>
    %cst_5 = arith.constant 0.00999999977 : f32
    %6 = vector.broadcast %cst_5 : f32 to vector<8x256xf32>
    %7 = arith.mulf %6, %5 : vector<8x256xf32>
    %8 = arith.maximumf %5, %7 : vector<8x256xf32>
    %c0_6 = arith.constant 0 : index
    %c0_7 = arith.constant 0 : index
    %9 = vector.load %arg4[%c0_6, %c0_7] : memref<256x256xf32, #tpu.memory_space<vmem>>, vector<256x256xf32>
    %cst_8 = arith.constant dense<0.000000e+00> : vector<8x256xf32>
    %10 = tpu.matmul %8, %9, %cst_8 {dimension_numbers = #tpu.dot_dimension_numbers<[1], [0], [0], [1], [0, 0, 1, 1], [], []>} : vector<8x256xf32>, vector<256x256xf32>, vector<8x256xf32> -> vector<8x256xf32>
    %c0_9 = arith.constant 0 : index
    %c0_10 = arith.constant 0 : index
    %11 = vector.load %arg5[%c0_9, %c0_10] : memref<1x256xf32, #tpu.memory_space<vmem>>, vector<1x256xf32>
    %12 = vector.broadcast %11 : vector<1x256xf32> to vector<8x256xf32>
    %13 = arith.addf %10, %12 : vector<8x256xf32>
    %cst_11 = arith.constant 0.00999999977 : f32
    %14 = vector.broadcast %cst_11 : f32 to vector<8x256xf32>
    %15 = arith.mulf %14, %13 : vector<8x256xf32>
    %16 = arith.maximumf %13, %15 : vector<8x256xf32>
    %c0_12 = arith.constant 0 : index
    %c0_13 = arith.constant 0 : index
    %17 = vector.load %arg6[%c0_12, %c0_13] : memref<8x256xf32, #tpu.memory_space<vmem>>, vector<8x256xf32>
    %cst_14 = arith.constant dense<0.000000e+00> : vector<8x8xf32>
    %18 = tpu.matmul %17, %16, %cst_14 {dimension_numbers = #tpu.dot_dimension_numbers<[1], [1], [0], [0], [0, 0, 1, 0], [], []>} : vector<8x256xf32>, vector<8x256xf32>, vector<8x8xf32> -> vector<8x8xf32>
    %19 = vector.extract_strided_slice %18 {offsets = [0, 0], sizes = [1, 8], strides = [1, 1]} : vector<8x8xf32> to vector<1x8xf32>
    %c0_15 = arith.constant 0 : index
    %c0_16 = arith.constant 0 : index
    %20 = vector.load %arg7[%c0_15, %c0_16] : memref<1x1xf32, #tpu.memory_space<vmem>>, vector<1x1xf32>
    %21 = vector.broadcast %20 : vector<1x1xf32> to vector<1x8xf32>
    %22 = arith.addf %19, %21 : vector<1x8xf32>
    %23 = arith.negf %22 : vector<1x8xf32>
    %24 = math.exp %23 : vector<1x8xf32>
    %cst_17 = arith.constant 1.000000e+00 : f32
    %25 = vector.broadcast %cst_17 : f32 to vector<1x8xf32>
    %26 = arith.addf %25, %24 : vector<1x8xf32>
    %27 = arith.divf %25, %26 : vector<1x8xf32>
    %c0_18 = arith.constant 0 : index
    %c0_19 = arith.constant 0 : index
    %28 = vector.load %arg8[%c0_18, %c0_19] : memref<1x8xf32, #tpu.memory_space<vmem>>, vector<1x8xf32>
    tpu.vector_store %arg8[%c0_18, %c0_19], %27 {strides = array<i32>} : memref<1x8xf32, #tpu.memory_space<vmem>>, vector<1x8xf32>,
    return
  }
  func.func @transform_0(%arg0: i32) -> (i32, i32) {
    %c0_i32 = arith.constant 0 : i32
    %c0_i32_0 = arith.constant 0 : i32
    return %arg0, %c0_i32 : i32, i32
  }
  func.func @transform_1(%arg0: i32) -> (i32, i32) {
    %c0_i32 = arith.constant 0 : i32
    %c0_i32_0 = arith.constant 0 : i32
    %c0_i32_1 = arith.constant 0 : i32
    return %c0_i32, %c0_i32_0 : i32, i32
  }
  func.func @transform_2(%arg0: i32) -> (i32, i32) {
    %c0_i32 = arith.constant 0 : i32
    %c0_i32_0 = arith.constant 0 : i32
    %c0_i32_1 = arith.constant 0 : i32
    return %c0_i32, %c0_i32_0 : i32, i32
  }
  func.func @transform_3(%arg0: i32) -> (i32, i32) {
    %c0_i32 = arith.constant 0 : i32
    %c0_i32_0 = arith.constant 0 : i32
    %c0_i32_1 = arith.constant 0 : i32
    return %c0_i32, %c0_i32_0 : i32, i32
  }
  func.func @transform_4(%arg0: i32) -> (i32, i32) {
    %c0_i32 = arith.constant 0 : i32
    %c0_i32_0 = arith.constant 0 : i32
    %c0_i32_1 = arith.constant 0 : i32
    return %c0_i32, %c0_i32_0 : i32, i32
  }
  func.func @transform_5(%arg0: i32) -> (i32, i32) {
    %c0_i32 = arith.constant 0 : i32
    %c0_i32_0 = arith.constant 0 : i32
    %c0_i32_1 = arith.constant 0 : i32
    return %c0_i32, %c0_i32_0 : i32, i32
  }
  func.func @transform_6(%arg0: i32) -> (i32, i32) {
    %c0_i32 = arith.constant 0 : i32
    %c0_i32_0 = arith.constant 0 : i32
    %c0_i32_1 = arith.constant 0 : i32
    return %c0_i32, %c0_i32_0 : i32, i32
  }
  func.func @transform_7(%arg0: i32) -> (i32, i32) {
    %c0_i32 = arith.constant 0 : i32
    %c0_i32_0 = arith.constant 0 : i32
    return %c0_i32, %arg0 : i32, i32
  }
}

</mosaic_0001>

<bundles_post_ra>
// kernel: tpu_custom_call.1
= control target key start
LH: loop header
LB: loop body
LE: loop exit
PB: predicated region body
PF: predicated region fallthrough
CT: control target
= control target key end

     0   :  { %s644_s0 = inlined_call_operand.hbm [shape: f32[8,64], index: 0, kind: input, shape index: {}]   ;;  %s645_s1 = inlined_call_operand.hbm [shape: f32[64,256], index: 1, kind: input, shape index: {}]   ;;  %s646_s2 = inlined_call_operand.vmem [shape: f32[1,256], index: 2, kind: input, shape index: {}]   ;;  %s647_s3 = inlined_call_operand.hbm [shape: f32[256,256], index: 3, kind: input, shape index: {}]   ;;  %s648_s4 = inlined_call_operand.vmem [shape: f32[1,256], index: 4, kind: input, shape index: {}]   ;;  %s649_s5 = inlined_call_operand.hbm [shape: f32[8,256], index: 5, kind: input, shape index: {}]   ;;  %s650_s6 = inlined_call_operand.<no memory space> [shape: f32[1,1], index: 6, kind: input, shape index: {}]   ;;  %s651_s7 = inlined_call_operand.hbm [shape: f32[1,8], index: 7, kind: output, shape index: {}]  }
   0x1   :  { %v12_v0 = vstv %s650_s6 }
   0x2   :  { %13 = vst [vmem:[#allocation2] sm:$0x1] %v12_v0 }
   0x3   :  { %14 = vsyncpa [#allocation4], 0 }
   0x4   :  { %15 = vsyncpa [#allocation7], 0 }
   0x5   :  { %16 = vsyncpa [#allocation10], 0 }
   0x6   :  { %17 = vsyncpa [#allocation5], 0  ;;  %s571_s26 = smov [#allocation6]  }
   0x7   :  { %s33_s27 = sshll.u32 %s571_s26, 4  ;;  %s34_s27 = int_to_ptr.vmem [resolvable:$true] %s33_s27 }
   0x8   :  { %s471_s28 = scalar_lea.vmem %s34_s27, 2048  ;;  %p476_p1 = scmp.lt.s32.totalorder %s34_s27, %s34_s27 }
   0x9   :  { %p472_p0 = scmp.ne.s32.totalorder %s34_s27, %s471_s28  ;;  %p477_p2 = scmp.lt.s32.totalorder %s471_s28, %s471_s28 }
   0xb   :  { %p478_p3 = por %p477_p2, %p476_p1 }
   0xd   :  { %p479_p4 = pnand %p478_p3, %p472_p0 }
   0xf   :  { %482 = shalt.err (!%p479_p4)
}
  0x10   :  { %s572_s29 = smov 256   ;;  %s573_s30 = smov 16  }
  0x11   :  { %39 = dma.hbm_to_vmem [thread:$0]  %s645_s1, 2048, %s34_s27, [#allocation7], %s572_s29, %s572_s29, %s573_s30  }
  0x12   :  { %s574_s6 = smov [#allocation3]   ;;  %s575_s11 = smov [#allocation8]  }
  0x13   :  { %s24_s10 = sshll.u32 %s574_s6, 4  ;;  %s47_s12 = sshll.u32 %s575_s11, 4  ;;  %s25_s10 = int_to_ptr.vmem [resolvable:$true] %s24_s10  ;;  %s48_s12 = int_to_ptr.vmem [resolvable:$true] %s47_s12 }
  0x14   :  { %s491_s13 = scalar_lea.vmem %s25_s10, 128  ;;  %p496_p6 = scmp.lt.s32.totalorder %s25_s10, %s25_s10 }
  0x15   :  { %p492_p5 = scmp.ne.s32.totalorder %s25_s10, %s491_s13  ;;  %p497_p7 = scmp.lt.s32.totalorder %s491_s13, %s491_s13 }
  0x17   :  { %p498_p8 = por %p497_p7, %p496_p6 }
  0x19   :  { %p499_p9 = pnand %p498_p8, %p492_p5 }
  0x1b   :  { %502 = shalt.err (!%p499_p9)
}
  0x1c   :  { %27 = dma.hbm_to_vmem [thread:$0]  %s644_s0, 128, %s25_s10, [#allocation4]  }
  0x1d   :  { %s511_s16 = scalar_lea.vmem %s48_s12, 8192  ;;  %p516_p11 = scmp.lt.s32.totalorder %s48_s12, %s48_s12 }
  0x1e   :  { %p512_p10 = scmp.ne.s32.totalorder %s48_s12, %s511_s16  ;;  %p517_p12 = scmp.lt.s32.totalorder %s511_s16, %s511_s16 }
  0x20   :  { %p518_p13 = por %p517_p12, %p516_p11 }
  0x22   :  { %p519_p0 = pnand %p518_p13, %p512_p10 }
  0x24   :  { %522 = shalt.err (!%p519_p0)
}
  0x25   :  { %53 = dma.hbm_to_vmem [thread:$0]  %s647_s3, 8192, %s48_s12, [#allocation7], %s572_s29, %s572_s29, %s573_s30  }
  0x26   :  { %s576_s18 = smov [#allocation9]  }
  0x27   :  { %s62_s19 = sshll.u32 %s576_s18, 4  ;;  %s63_s19 = int_to_ptr.vmem [resolvable:$true] %s62_s19 }
  0x28   :  { %s531_s20 = scalar_lea.vmem %s63_s19, 256  ;;  %p536_p2 = scmp.lt.s32.totalorder %s63_s19, %s63_s19 }
  0x29   :  { %p532_p1 = scmp.ne.s32.totalorder %s63_s19, %s531_s20  ;;  %p537_p3 = scmp.lt.s32.totalorder %s531_s20, %s531_s20 }
  0x2b   :  { %p538_p4 = por %p537_p3, %p536_p2 }
  0x2d   :  { %p539_p5 = pnand %p538_p4, %p532_p1 }
  0x2f   :  { %542 = shalt.err (!%p539_p5)
}
  0x30   :  { %65 = dma.hbm_to_vmem [thread:$0]  %s649_s5, 256, %s63_s19, [#allocation10]  }
  0x31   :  { %563 = dma.done.wait [#allocation4], 128  }
  0x32   :  { %564 = vsyncadd [#allocation4], 4294967168 }
  0x33   :  { %565 = dma.done.wait [#allocation7], 10240  }
  0x34   :  { %566 = vsyncadd [#allocation7], 4294957056 }
  0x35   :  { %567 = dma.done.wait [#allocation10], 256  }
  0x36   :  { %568 = vsyncadd [#allocation10], 4294967040  ;;  %v577_v1 = vmov 0.0   ;;  %v96_v2 = vld [vmem:[#allocation6 + $0x78] sm:$0xff]  ;;  %v95_v3 = vld [vmem:[#allocation6 + $0x70] sm:$0xff]  ;;  %vm109_vm0 = vcmask 523264  }
  0x37   :  { %177 = vmatprep.mubr.f32.mxu0 %v577_v1  ;;  %v94_v4 = vld [vmem:[#allocation6 + $0x68] sm:$0xff]  ;;  %129 = vmatprep.subr.mxu0 %v96_v2  ;;  %v93_v5 = vld [vmem:[#allocation6 + $0x60] sm:$0xff]  ;;  %v92_v6 = vld [vmem:[#allocation6 + $0x58] sm:$0xff]  ;;  %vm428_vm1 = vcmask 57344  }
  0x38   :  { %130 = vmatpush1.msra.mxu0 %v95_v3  ;;  %v91_v7 = vld [vmem:[#allocation6 + $0x50] sm:$0xff]  ;;  %v90_v8 = vld [vmem:[#allocation6 + $0x48] sm:$0xff]  ;;  %v89_v9 = vld [vmem:[#allocation6 + $0x40] sm:$0xff] }
  0x39   :  { %131 = vmatprep.subr.mxu0 %v94_v4  ;;  %v88_v10 = vld [vmem:[#allocation6 + $0x38] sm:$0xff]  ;;  %v218_v12 = vld [vmem:[#allocation8 + $0xf0] sm:$0xff]  ;;  %v217_v13 = vld [vmem:[#allocation8 + $0xe8] sm:$0xff] }
  0x3a   :  { %132 = vmatpush1.msra.mxu0 %v93_v5  ;;  %v219_v11 = vld [vmem:[#allocation8 + $0xf8] sm:$0xff]  ;;  %v216_v14 = vld [vmem:[#allocation8 + $0xe0] sm:$0xff]  ;;  %v87_v15 = vld [vmem:[#allocation6 + $0x30] sm:$0xff] }
  0x3b   :  { %133 = vmatprep.subr.mxu0 %v92_v6  ;;  %264 = vmatprep.subr.mxu1 %v219_v11  ;;  %v215_v16 = vld [vmem:[#allocation8 + $0xd8] sm:$0xff]  ;;  %v86_v17 = vld [vmem:[#allocation6 + $0x28] sm:$0xff]  ;;  %v214_v18 = vld [vmem:[#allocation8 + $0xd0] sm:$0xff] }
  0x3c   :  { %134 = vmatpush1.msra.mxu0 %v91_v7  ;;  %265 = vmatpush1.msra.mxu1 %v218_v12  ;;  %v85_v19 = vld [vmem:[#allocation6 + $0x20] sm:$0xff]  ;;  %v213_v20 = vld [vmem:[#allocation8 + $0xc8] sm:$0xff]  ;;  %v84_v21 = vld [vmem:[#allocation6 + $0x18] sm:$0xff] }
  0x3d   :  { %135 = vmatprep.subr.mxu0 %v90_v8  ;;  %266 = vmatprep.subr.mxu1 %v217_v13  ;;  %v212_v22 = vld [vmem:[#allocation8 + $0xc0] sm:$0xff]  ;;  %v83_v23 = vld [vmem:[#allocation6 + $0x10] sm:$0xff]  ;;  %v211_v24 = vld [vmem:[#allocation8 + $0xb8] sm:$0xff] }
  0x3e   :  { %136 = vmatpush1.msra.mxu0 %v89_v9  ;;  %267 = vmatpush1.msra.mxu1 %v216_v14  ;;  %v82_v25 = vld [vmem:[#allocation6 + $0x8] sm:$0xff]  ;;  %v210_v26 = vld [vmem:[#allocation8 + $0xb0] sm:$0xff]  ;;  %v81_v27 = vld [vmem:[#allocation6] sm:$0xff] }
  0x3f   :  { %137 = vmatprep.subr.mxu0 %v88_v10  ;;  %268 = vmatprep.subr.mxu1 %v215_v16  ;;  %v209_v28 = vld [vmem:[#allocation8 + $0xa8] sm:$0xff]  ;;  %v80_v29 = vld [vmem:[#allocation3] sm:$0xff]  ;;  %v208_v30 = vld [vmem:[#allocation8 + $0xa0] sm:$0xff] }
  0x40   :  { %138 = vmatpush1.msra.mxu0 %v87_v15  ;;  %269 = vmatpush1.msra.mxu1 %v214_v18  ;;  %v207_v31 = vld [vmem:[#allocation8 + $0x98] sm:$0xff]  ;;  %v206_v32 = vld [vmem:[#allocation8 + $0x90] sm:$0xff]  ;;  %v205_v33 = vld [vmem:[#allocation8 + $0x88] sm:$0xff] }
  0x41   :  { %139 = vmatprep.subr.mxu0 %v86_v17  ;;  %270 = vmatprep.subr.mxu1 %v213_v20  ;;  %v204_v34 = vld [vmem:[#allocation8 + $0x80] sm:$0xff]  ;;  %v203_v35 = vld [vmem:[#allocation8 + $0x78] sm:$0xff]  ;;  %v202_v36 = vld [vmem:[#allocation8 + $0x70] sm:$0xff] }
  0x42   :  { %140 = vmatpush1.msra.mxu0 %v85_v19  ;;  %271 = vmatpush1.msra.mxu1 %v212_v22  ;;  %v201_v37 = vld [vmem:[#allocation8 + $0x68] sm:$0xff]  ;;  %v200_v38 = vld [vmem:[#allocation8 + $0x60] sm:$0xff]  ;;  %v199_v39 = vld [vmem:[#allocation8 + $0x58] sm:$0xff]  ;;  %v99_v19 = vlaneseq }
  0x43   :  { %141 = vmatprep.subr.mxu0 %v84_v21  ;;  %272 = vmatprep.subr.mxu1 %v211_v24  ;;  %v198_v40 = vld [vmem:[#allocation8 + $0x50] sm:$0xff]  ;;  %v197_v41 = vld [vmem:[#allocation8 + $0x48] sm:$0xff]  ;;  %v196_v42 = vld [vmem:[#allocation8 + $0x40] sm:$0xff] }
  0x44   :  { %142 = vmatpush1.msra.mxu0 %v83_v23  ;;  %273 = vmatpush1.msra.mxu1 %v210_v26  ;;  %v195_v43 = vld [vmem:[#allocation8 + $0x38] sm:$0xff]  ;;  %v194_v44 = vld [vmem:[#allocation8 + $0x30] sm:$0xff]  ;;  %v193_v45 = vld [vmem:[#allocation8 + $0x28] sm:$0xff]  ;;  %v100_v20 = vshrl.u32 %v99_v19, 7 }
  0x45   :  { %143 = vmatprep.subr.mxu0 %v82_v25  ;;  %274 = vmatprep.subr.mxu1 %v209_v28  ;;  %v192_v46 = vld [vmem:[#allocation8 + $0x20] sm:$0xff]  ;;  %v191_v47 = vld [vmem:[#allocation8 + $0x18] sm:$0xff]  ;;  %v190_v48 = vld [vmem:[#allocation8 + $0x10] sm:$0xff] }
  0x46   :  { %144 = vmatpush1.msra.mxu0 %v81_v27  ;;  %275 = vmatpush1.msra.mxu1 %v208_v30  ;;  %v189_v49 = vld [vmem:[#allocation8 + $0x8] sm:$0xff]  ;;  %v188_v50 = vld [vmem:[#allocation8] sm:$0xff]  ;;  %v251_v51 = vld [vmem:[#allocation8 + $0x1f8] sm:$0xff]  ;;  %v101_v21 = vsub.s32 0, %v100_v20  ;;  %v105_v23 = vsub.s32 1, %v100_v20 }
  0x47   :  { %447 = vmatmul.mubr.msk.f32.vlgmr.msra.gmra.mxu0 %vm109_vm0, %v80_v29  ;;  %276 = vmatprep.subr.mxu1 %v207_v31  ;;  %v250_v52 = vld [vmem:[#allocation8 + $0x1f0] sm:$0xff]  ;;  %v249_v53 = vld [vmem:[#allocation8 + $0x1e8] sm:$0xff]  ;;  %v248_v54 = vld [vmem:[#allocation8 + $0x1e0] sm:$0xff] }
  0x48   :  { %277 = vmatpush1.msra.mxu1 %v206_v32  ;;  %v247_v55 = vld [vmem:[#allocation8 + $0x1d8] sm:$0xff]  ;;  %v246_v56 = vld [vmem:[#allocation8 + $0x1d0] sm:$0xff]  ;;  %v245_v57 = vld [vmem:[#allocation8 + $0x1c8] sm:$0xff] }
  0x49   :  { %278 = vmatprep.subr.mxu1 %v205_v33  ;;  %v244_v58 = vld [vmem:[#allocation8 + $0x1c0] sm:$0xff]  ;;  %v243_v59 = vld [vmem:[#allocation8 + $0x1b8] sm:$0xff]  ;;  %v242_v60 = vld [vmem:[#allocation8 + $0x1b0] sm:$0xff] }
  0x4a   :  { %279 = vmatpush1.msra.mxu1 %v204_v34  ;;  %v241_v61 = vld [vmem:[#allocation8 + $0x1a8] sm:$0xff]  ;;  %v240_v62 = vld [vmem:[#allocation8 + $0x1a0] sm:$0xff]  ;;  %v239_v63 = vld [vmem:[#allocation8 + $0x198] sm:$0xff] }
  0x4b   :  { %280 = vmatprep.subr.mxu1 %v203_v35  ;;  %v238_v0 = vld [vmem:[#allocation8 + $0x190] sm:$0xff]  ;;  %v237_v1 = vld [vmem:[#allocation8 + $0x188] sm:$0xff]  ;;  %v236_v2 = vld [vmem:[#allocation8 + $0x180] sm:$0xff] }
  0x4c   :  { %281 = vmatpush1.msra.mxu1 %v202_v36  ;;  %v235_v3 = vld [vmem:[#allocation8 + $0x178] sm:$0xff]  ;;  %v234_v4 = vld [vmem:[#allocation8 + $0x170] sm:$0xff]  ;;  %v233_v5 = vld [vmem:[#allocation8 + $0x168] sm:$0xff]  ;;  %v578_v36 = vmov 0  }
  0x4d   :  { %282 = vmatprep.subr.mxu1 %v201_v37  ;;  %v232_v6 = vld [vmem:[#allocation8 + $0x160] sm:$0xff]  ;;  %v231_v7 = vld [vmem:[#allocation8 + $0x158] sm:$0xff]  ;;  %v230_v8 = vld [vmem:[#allocation8 + $0x150] sm:$0xff]  ;;  %458 = vset.pattern.permute.xlu0 %v578_v36 }
  0x4e   :  { %283 = vmatpush1.msra.mxu1 %v200_v38  ;;  %v229_v9 = vld [vmem:[#allocation8 + $0x148] sm:$0xff]  ;;  %v228_v10 = vld [vmem:[#allocation8 + $0x140] sm:$0xff]  ;;  %v227_v11 = vld [vmem:[#allocation8 + $0x138] sm:$0xff] }
  0x4f   :  { %284 = vmatprep.subr.mxu1 %v199_v39  ;;  %v226_v12 = vld [vmem:[#allocation8 + $0x130] sm:$0xff]  ;;  %v225_v13 = vld [vmem:[#allocation8 + $0x128] sm:$0xff]  ;;  %v224_v14 = vld [vmem:[#allocation8 + $0x120] sm:$0xff] }
  0x50   :  { %285 = vmatpush1.msra.mxu1 %v198_v40  ;;  %v223_v15 = vld [vmem:[#allocation8 + $0x118] sm:$0xff]  ;;  %v222_v16 = vld [vmem:[#allocation8 + $0x110] sm:$0xff]  ;;  %v221_v17 = vld [vmem:[#allocation8 + $0x108] sm:$0xff] }
  0x51   :  { %286 = vmatprep.subr.mxu1 %v197_v41  ;;  %v220_v18 = vld [vmem:[#allocation8 + $0x100] sm:$0xff]  ;;  %v97_v22 = vld [vmem:[%s646_s2] sm:$0x3]  ;;  %v340_v34 = vld [vmem:[#allocation9 + $0x8] sm:$0xff] }
  0x52   :  { %287 = vmatpush1.msra.mxu1 %v196_v42  ;;  %v102_v24 = vrot.slane %v97_v22, %v101_v21  ;;  %v106_v25 = vrot.slane %v97_v22, %v105_v23  ;;  %405 = vmatprep.mubr.f32.mxu0 %v340_v34  ;;  %v411_v35 = vld [vmem:[#allocation2] sm:$0x1] }
  0x53   :  { %288 = vmatprep.subr.mxu1 %v195_v43  ;;  %414 = vperm.xlu0 %458, %v411_v35   ;;  %v252_v37 = vld [vmem:[%s648_s4] sm:$0x3]  ;;  %s579_s4 = smov [#allocation11]  }
  0x54   :  { %289 = vmatpush1.msra.mxu1 %v194_v44  ;;  %v257_v38 = vrot.slane %v252_v37, %v101_v21  ;;  %v261_v39 = vrot.slane %v252_v37, %v105_v23  ;;  %s436_s23 = sshll.u32 %s579_s4, 4  ;;  %s437_s23 = int_to_ptr.vmem [resolvable:$true] %s436_s23 }
  0x55   :  { %290 = vmatprep.subr.mxu1 %v193_v45  ;;  %s543_s24 = scalar_lea.vmem %s437_s23, 16  ;;  %s547_s25 = scalar_lea.vmem %s437_s23, 32 }
  0x56   :  { %291 = vmatpush1.msra.mxu1 %v192_v46  ;;  %p544_p6 = scmp.ne.s32.totalorder %s437_s23, %s543_s24  ;;  %p548_p7 = scmp.lt.s32.totalorder %s437_s23, %s437_s23 }
  0x57   :  { %292 = vmatprep.subr.mxu1 %v191_v47  ;;  %p549_p8 = scmp.lt.s32.totalorder %s547_s25, %s543_s24 }
  0x58   :  { %293 = vmatpush1.msra.mxu1 %v190_v48  ;;  %v339_v48 = vld [vmem:[#allocation9] sm:$0xff] }
  0x59   :  { %294 = vmatprep.subr.mxu1 %v189_v49  ;;  %p550_p9 = por %p549_p8, %p548_p7 }
  0x5a   :  { %295 = vmatpush1.msra.mxu1 %v188_v50 }
  0x5b   :  { %296 = vmatprep.subr.mxu1 %v251_v51  ;;  %p551_p10 = pnand %p550_p9, %p544_p6 }
  0x5c   :  { %297 = vmatpush2.msra.mxu1 %v250_v52 }
  0x5d   :  { %298 = vmatprep.subr.mxu1 %v249_v53 }
  0x5e   :  { %299 = vmatpush2.msra.mxu1 %v248_v54 }
  0x5f   :  { %300 = vmatprep.subr.mxu1 %v247_v55 }
  0x60   :  { %301 = vmatpush2.msra.mxu1 %v246_v56 }
  0x61   :  { %302 = vmatprep.subr.mxu1 %v245_v57 }
  0x62   :  { %303 = vmatpush2.msra.mxu1 %v244_v58 }
  0x63   :  { %304 = vmatprep.subr.mxu1 %v243_v59 }
  0x64   :  { %305 = vmatpush2.msra.mxu1 %v242_v60 }
  0x65   :  { %306 = vmatprep.subr.mxu1 %v241_v61 }
  0x66   :  { %307 = vmatpush2.msra.mxu1 %v240_v62 }
  0x67   :  { %308 = vmatprep.subr.mxu1 %v239_v63 }
  0x68   :  { %309 = vmatpush2.msra.mxu1 %v238_v0 }
  0x69   :  { %310 = vmatprep.subr.mxu1 %v237_v1 }
  0x6a   :  { %311 = vmatpush2.msra.mxu1 %v236_v2 }
  0x6b   :  { %312 = vmatprep.subr.mxu1 %v235_v3 }
  0x6c   :  { %313 = vmatpush2.msra.mxu1 %v234_v4 }
  0x6d   :  { %314 = vmatprep.subr.mxu1 %v233_v5 }
  0x6e   :  { %315 = vmatpush2.msra.mxu1 %v232_v6 }
  0x6f   :  { %316 = vmatprep.subr.mxu1 %v231_v7 }
  0x70   :  { %317 = vmatpush2.msra.mxu1 %v230_v8 }
  0x71   :  { %318 = vmatprep.subr.mxu1 %v229_v9 }
  0x72   :  { %319 = vmatpush2.msra.mxu1 %v228_v10 }
  0x73   :  { %320 = vmatprep.subr.mxu1 %v227_v11 }
  0x74   :  { %321 = vmatpush2.msra.mxu1 %v226_v12 }
  0x75   :  { %322 = vmatprep.subr.mxu1 %v225_v13 }
  0x76   :  { %323 = vmatpush2.msra.mxu1 %v224_v14 }
  0x77   :  { %324 = vmatprep.subr.mxu1 %v223_v15 }
  0x78   :  { %325 = vmatpush2.msra.mxu1 %v222_v16 }
  0x79   :  { %326 = vmatprep.subr.mxu1 %v221_v17 }
  0x7a   :  { %327 = vmatpush2.msra.mxu1 %v220_v18 }
  0xce   :  { %v415_v49 = vpop.permute.xlu0 %414 }
  0xcf   :  { %v420_v50 = vrot.slane %v415_v49, %v101_v21 }
 0x107   :  { %v179_v26 = vpop.f32.mrf.mxu0 }
 0x108   :  { %v180_v27 = vadd.f32 %v179_v26, %v102_v24 }
 0x109   :  { %v181_v28 = vpop.f32.mrf.mxu0 }
 0x10a   :  { %v182_v29 = vadd.f32 %v181_v28, %v106_v25  ;;  %v184_v30 = vmul.f32 0.01, %v180_v27 }
 0x10c   :  { %v185_v31 = vmul.f32 0.01, %v182_v29  ;;  %v186_v33 = vmax.f32 %v180_v27, %v184_v30 }
 0x10e   :  { %v187_v32 = vmax.f32 %v182_v29, %v185_v31 }
 0x110   :  { %328 = vmatprep.mubr.f32.mxu1 %v187_v32 }
 0x111   :  { %329 = vmatmul.mubr.f32.vlgmr.msra.gmra.mxu1 %v186_v33 }
 0x1d1   :  { %v330_v40 = vpop.f32.mrf.mxu1 }
 0x1d2   :  { %v331_v41 = vadd.f32 %v330_v40, %v257_v38 }
 0x1d3   :  { %v332_v42 = vpop.f32.mrf.mxu1 }
 0x1d4   :  { %v333_v43 = vadd.f32 %v332_v42, %v261_v39  ;;  %v335_v44 = vmul.f32 0.01, %v331_v41 }
 0x1d6   :  { %v336_v45 = vmul.f32 0.01, %v333_v43  ;;  %v337_v47 = vmax.f32 %v331_v41, %v335_v44 }
 0x1d8   :  { %v338_v46 = vmax.f32 %v333_v43, %v336_v45 }
 0x1da   :  { %371 = vmatprep.subr.mxu0 %v338_v46 }
 0x1db   :  { %372 = vmatpush1.xpose.msra.mxu0 %v337_v47 }
 0x1de   :  { %406 = vmatmul.mubr.f32.vlgmr.msra.gmra.mxu0 %v339_v48 }
 0x29e   :  { %v407_v51 = vpop.f32.mrf.mxu0 }
 0x29f   :  { %v421_v52 = vadd.f32 %v420_v50, %v407_v51 }
 0x2a0   :  { %v409_v53 = vpop.f32.mrf.mxu0 }
 0x2a1   :  { %v448_v54 = vmul.f32 -1.442695, %v421_v52 }
 0x2a3   :  { %459 = vpow2.f32 %v448_v54 }
 0x2b0   :  { %v460_v55 = vpop.eup %459 }
 0x2b1   :  { %v425_v56 = vadd.f32 1.0, %v460_v55 }
 0x2b3   :  { %461 = vrcp.f32 %v425_v56 }
 0x2c0   :  { %v462_v57 = vpop.eup %461 }
 0x2c1   :  { %429 = vst.msk [vmem:[#allocation11] sm:$0x1] %vm428_vm1, %v462_v57 }
 0x2c2   :  { %554 = shalt.err (!%p551_p10)
}
 0x2c3   :  { %439 = dma.vmem_to_hbm [thread:$0]  %s437_s23, 16, %s651_s7, [#allocation5]  }
 0x2c4   :  { %569 = dma.done.wait [#allocation5], 16  }
 0x2c5   :  { %570 = vsyncadd [#allocation5], 4294967280 }
 0x2c6   :  { %443 = vsyncpa [#allocation4], 1 }
 0x2c7   :  { %444 = vsyncpa [#allocation7], 1 }
 0x2c8   :  { %445 = vsyncpa [#allocation10], 1 }
 0x2c9   :  { %446 = vsyncpa [#allocation5], 1 }

</bundles_post_ra>
